<compile_context>
chip_gen: v6e
topology: v6e:2x2x1
jax: 0.10.0
libtpu: 0.0.40
codegen_flags: <defaults>
</compile_context>

<pallas_src>
import functools

import jax
import jax.numpy as jnp
import numpy as np
from jax.experimental import pallas as pl
from jax.experimental.pallas import tpu as pltpu

_LANE = 128
_SUBLANE = 8
# Below this many rows the fixed pallas_call launch + pad/trim overhead
# dominates; XLA fuses the short elementwise chain into one HBM pass.
_SMALL_N_FASTPATH = 16384


def _reward_kernel(x_ref, o_ref, *, target1, target2, isgaussian):
    # x_ref : (2, TILE_R, 128) float32 in VMEM; x_ref[0] = x[:,0], x_ref[1] = x[:,1]
    # o_ref : (TILE_R, 128) float32 in VMEM
    x0 = x_ref[0]
    x1 = x_ref[1]

    t1 = jnp.float32(target1)
    d1 = t1 - x1                                     # scalar broadcast
    if isgaussian:
        d0 = t1 - x0
    else:
        # target[:,0] = target2 if x[:,1] < target1 else target1
        t0 = jnp.where(x1 < t1, jnp.float32(target2), t1)
        d0 = t0 - x0

    d2 = d0 * d0 + d1 * d1                           # pure VPU elementwise
    # NOTE: keep jnp.sqrt (not d2 * rsqrt(d2)) so d2 == 0 -> reward == 1.
    o_ref[...] = jnp.exp(-jnp.sqrt(d2))


def _reward_jnp(x, target1, target2, isgaussian):
    """Small-N fast path: one fused XLA elementwise pass, no padding."""
    x0 = x[:, 0]
    x1 = x[:, 1]
    t1 = jnp.float32(target1)
    d1 = t1 - x1
    if isgaussian:
        d0 = t1 - x0
    else:
        d0 = jnp.where(x1 < t1, jnp.float32(target2), t1) - x0
    return jnp.exp(-jnp.sqrt(d0 * d0 + d1 * d1))


def _round_up(a, b):
    return ((a + b - 1) // b) * b


def reward_pallas(x, target_val1=7, target_val2=3, isgaussian=True,
                  tile_rows=1024, min_kernel_rows=_SMALL_N_FASTPATH):
    """Pallas implementation of Reward.forward for a batched (N, 2) input."""
    x = jnp.asarray(x, dtype=jnp.float32)
    n = x.shape[0]

    if n == 0:
        return jnp.zeros((0,), jnp.float32)

    if n < min_kernel_rows:
        return _reward_jnp(x, target_val1, target_val2, isgaussian)

    # --- lane-dense slab layout: one pad + transpose, (N,2) -> (2,r_pad,128) ---
    r = pl.cdiv(n, _LANE)                            # slab rows needed
    # Aim for ~8 grid steps (pipelining + megacore split on v7x); keep tile_r a
    # multiple of 8 sublanes and capped at tile_rows (VMEM budget).
    tile_r = min(int(tile_rows),
                 max(_SUBLANE, _round_up(pl.cdiv(r, 8), _SUBLANE)))
    tile_r = _round_up(tile_r, _SUBLANE)
    r_pad = _round_up(r, tile_r)                     # whole tiles only
    n_pad = r_pad * _LANE

    xs = jnp.pad(x, ((0, n_pad - n), (0, 0))).T.reshape(2, r_pad, _LANE)

    kernel = functools.partial(
        _reward_kernel,
        target1=float(target_val1),
        target2=float(target_val2),
        isgaussian=bool(isgaussian),
    )

    out = pl.pallas_call(
        kernel,
        out_shape=jax.ShapeDtypeStruct((r_pad, _LANE), jnp.float32),
        grid=(r_pad // tile_r,),
        in_specs=[pl.BlockSpec((2, tile_r, _LANE), lambda i: (0, i, 0))],
        out_specs=pl.BlockSpec((tile_r, _LANE), lambda i: (i, 0)),
        compiler_params=pltpu.CompilerParams(
            dimension_semantics=("parallel",)),
    )(xs)

    # trim padding, return (N,) like the torch module
    return out.reshape(-1)[:n]


def _reward_ref_numpy(x, target_val1=7, target_val2=3, isgaussian=True):
    """Pure-numpy reference mirroring the PyTorch forward."""
    x = np.asarray(x, dtype=np.float32)
    n = x.shape[0]
    t = np.full((n, 2), float(target_val1), dtype=np.float32)
    if not isgaussian:
        t[:, 0] = np.where(x[:, 1] < target_val1,
                           float(target_val2), float(target_val1))
    d = np.sqrt(((t - x) ** 2).sum(axis=1))
    return np.exp(-d)


if __name__ == "__main__":
    key = jax.random.PRNGKey(0)
    k1, k2 = jax.random.split(key)
    # Small batch of 2-D samples (the forward implies x of shape (N, 2)).
    x_small = jax.random.normal(k1, (8, 2), dtype=jnp.float32) * 4.0 + 5.0
    # Moderately larger batch to exercise the multi-step Pallas grid path.
    x_big = jax.random.normal(k2, (3000, 2), dtype=jnp.float32) * 4.0 + 5.0

    ok = True
    for isgaussian in (True, False):
        # Fast path (plain jnp) on the small batch.
        out = jax.block_until_ready(
            reward_pallas(x_small, 7, 3, isgaussian=isgaussian))
        ref = _reward_ref_numpy(np.asarray(x_small), 7, 3, isgaussian)
        ok &= np.allclose(np.asarray(out), ref, rtol=1e-5, atol=1e-5)

        # Force the Pallas kernel path on both sizes (grid=1 and grid=3).
        for xin in (x_small, x_big):
            out = jax.block_until_ready(
                reward_pallas(xin, 7, 3, isgaussian=isgaussian,
                              min_kernel_rows=0))
            ref = _reward_ref_numpy(np.asarray(xin), 7, 3, isgaussian)
            ok &= np.allclose(np.asarray(out), ref, rtol=1e-5, atol=1e-5)

    if ok:
        print("KERNEL_OK")
</pallas_src>

<mosaic_0001>
module attributes {stable_mosaic.version = 11 : i64} {
  func.func @_reward_kernel(%arg0: i32, %arg1: memref<2x8x128xf32, #tpu.memory_space<vmem>>, %arg2: memref<8x128xf32, #tpu.memory_space<vmem>>) attributes {dimension_semantics = [#tpu.dimension_semantics<parallel>], iteration_bounds = array<i64: 1>, scalar_prefetch = 0 : i64, scratch_operands = 0 : i64, tpu.core_type = #tpu.core_type<tc>, window_params = [{transform_indices = @transform_0, window_bounds = array<i64: 2, 8, 128>}, {transform_indices = @transform_1, window_bounds = array<i64: 8, 128>}]} {
    %c0 = arith.constant 0 : index
    %c0_0 = arith.constant 0 : index
    %c0_1 = arith.constant 0 : index
    %0 = vector.load %arg1[%c0, %c0_0, %c0_1] : memref<2x8x128xf32, #tpu.memory_space<vmem>>, vector<1x8x128xf32>
    %1 = vector.shape_cast %0 : vector<1x8x128xf32> to vector<8x128xf32>
    %c1 = arith.constant 1 : index
    %c0_2 = arith.constant 0 : index
    %c0_3 = arith.constant 0 : index
    %2 = vector.load %arg1[%c1, %c0_2, %c0_3] : memref<2x8x128xf32, #tpu.memory_space<vmem>>, vector<1x8x128xf32>
    %3 = vector.shape_cast %2 : vector<1x8x128xf32> to vector<8x128xf32>
    %cst = arith.constant 7.000000e+00 : f32
    %4 = vector.broadcast %cst : f32 to vector<8x128xf32>
    %5 = arith.subf %4, %3 : vector<8x128xf32>
    %cst_4 = arith.constant 7.000000e+00 : f32
    %6 = vector.broadcast %cst_4 : f32 to vector<8x128xf32>
    %7 = arith.subf %6, %1 : vector<8x128xf32>
    %8 = arith.mulf %7, %7 : vector<8x128xf32>
    %9 = arith.mulf %5, %5 : vector<8x128xf32>
    %10 = arith.addf %8, %9 : vector<8x128xf32>
    %11 = math.sqrt %10 : vector<8x128xf32>
    %cst_5 = arith.constant 0.000000e+00 : f32
    %12 = vector.broadcast %cst_5 : f32 to vector<8x128xf32>
    %13 = arith.subf %12, %11 : vector<8x128xf32>
    %14 = math.exp %13 : vector<8x128xf32>
    %c0_6 = arith.constant 0 : index
    %c0_7 = arith.constant 0 : index
    %15 = vector.load %arg2[%c0_6, %c0_7] : memref<8x128xf32, #tpu.memory_space<vmem>>, vector<8x128xf32>
    tpu.vector_store %arg2[%c0_6, %c0_7], %14 {strides = array<i32>} : memref<8x128xf32, #tpu.memory_space<vmem>>, vector<8x128xf32>,
    return
  }
  func.func @transform_0(%arg0: i32) -> (i32, i32, i32) {
    %c0_i32 = arith.constant 0 : i32
    %c0_i32_0 = arith.constant 0 : i32
    %c0_i32_1 = arith.constant 0 : i32
    return %c0_i32, %arg0, %c0_i32_0 : i32, i32, i32
  }
  func.func @transform_1(%arg0: i32) -> (i32, i32) {
    %c0_i32 = arith.constant 0 : i32
    %c0_i32_0 = arith.constant 0 : i32
    return %arg0, %c0_i32 : i32, i32
  }
}

</mosaic_0001>

<bundles_post_ra>
// kernel: tpu_custom_call.1
= control target key start
LH: loop header
LB: loop body
LE: loop exit
PB: predicated region body
PF: predicated region fallthrough
CT: control target
= control target key end

     0   :  { %6 = vsyncpa [#allocation3], 0  ;;  %s129_s0 = inlined_call_operand.hbm [shape: f32[2,8,128], index: 0, kind: input, shape index: {}]   ;;  %s130_s1 = inlined_call_operand.hbm [shape: f32[8,128], index: 1, kind: output, shape index: {}]  }
   0x1   :  { %7 = vsyncpa [#allocation4], 0  ;;  %s109_s6 = smov [#allocation2]  }
   0x2   :  { %s13_s7 = sshll.u32 %s109_s6, 4  ;;  %s14_s7 = int_to_ptr.vmem [resolvable:$true] %s13_s7 }
   0x3   :  { %s73_s8 = scalar_lea.vmem %s14_s7, 256  ;;  %p78_p1 = scmp.lt.s32.totalorder %s14_s7, %s14_s7 }
   0x4   :  { %p74_p0 = scmp.ne.s32.totalorder %s14_s7, %s73_s8  ;;  %p79_p2 = scmp.lt.s32.totalorder %s73_s8, %s73_s8 }
   0x6   :  { %p80_p3 = por %p79_p2, %p78_p1 }
   0x8   :  { %p81_p4 = pnand %p80_p3, %p74_p0 }
   0xa   :  { %84 = shalt.err (!%p81_p4)
}
   0xb   :  { %s110_s9 = smov 128   ;;  %s111_s10 = smov 8  }
   0xc   :  { %19 = dma.hbm_to_vmem [thread:$0]  %s129_s0, 256, %s14_s7, [#allocation3], %s110_s9, %s110_s9, %s111_s10  }
   0xd   :  { %105 = dma.done.wait [#allocation3], 256  }
   0xe   :  { %106 = vsyncadd [#allocation3], 4294967040  ;;  %v23_v0 = vld [vmem:[#allocation2] sm:$0xff]  ;;  %v25_v1 = vld [vmem:[#allocation2 + $0x8] sm:$0xff]  ;;  %s112_s0 = smov [#allocation5]  }
   0xf   :  { %v26_v2 = vsub.f32 7.0, %v25_v1  ;;  %v27_v3 = vsub.f32 7.0, %v23_v0  ;;  %s48_s13 = sshll.u32 %s112_s0, 4  ;;  %s49_s13 = int_to_ptr.vmem [resolvable:$true] %s48_s13 }
  0x10   :  { %s85_s14 = scalar_lea.vmem %s49_s13, 128  ;;  %p90_p6 = scmp.lt.s32.totalorder %s49_s13, %s49_s13 }
  0x11   :  { %v28_v4 = vmul.f32 %v27_v3, %v27_v3  ;;  %v29_v5 = vmul.f32 %v26_v2, %v26_v2  ;;  %p86_p5 = scmp.ne.s32.totalorder %s49_s13, %s85_s14  ;;  %p91_p7 = scmp.lt.s32.totalorder %s85_s14, %s85_s14 }
  0x13   :  { %v30_v6 = vadd.f32 %v29_v5, %v28_v4  ;;  %p92_p8 = por %p91_p7, %p90_p6 }
  0x15   :  { %61 = vrsqrt.f32 %v30_v6  ;;  %vm33_vm0 = vcmp.eq.f32.partialorder %v30_v6, inf  ;;  %v36_v8 = vand.u32 2147483648, %v30_v6  ;;  %vm35_vm1 = vcmp.eq.f32.partialorder %v30_v6, 0.0  ;;  %p93_p9 = pnand %p92_p8, %p86_p5 }
  0x22   :  { %v62_v7 = vpop.eup %61 }
  0x23   :  { %v32_v9 = vmul.f32 %v62_v7, %v30_v6 }
  0x25   :  { %v34_v10 = vsel %vm33_vm0, %v30_v6, %v32_v9 }
  0x26   :  { %v37_v11 = vsel %vm35_vm1, %v36_v8, %v34_v10 }
  0x27   :  { %v38_v12 = vsub.f32 0.0, %v37_v11 }
  0x29   :  { %v39_v13 = vmul.f32 1.442695, %v38_v12 }
  0x2b   :  { %63 = vpow2.f32 %v39_v13 }
  0x38   :  { %v64_v14 = vpop.eup %63 }
  0x39   :  { %41 = vst [vmem:[#allocation5] sm:$0xff] %v64_v14 }
  0x3a   :  { %96 = shalt.err (!%p93_p9)
}
  0x3b   :  { %51 = dma.vmem_to_hbm [thread:$0]  %s49_s13, 128, %s130_s1, [#allocation4]  }
  0x3c   :  { %107 = dma.done.wait [#allocation4], 128  }
  0x3d   :  { %108 = vsyncadd [#allocation4], 4294967168 }
  0x3e   :  { %55 = vsyncpa [#allocation3], 1 }
  0x3f   :  { %56 = vsyncpa [#allocation4], 1 }

</bundles_post_ra>
